<compile_context>
chip_gen: v7x
topology: tpu7x:2x2x1
jax: 0.10.0
libtpu: 0.0.40
codegen_flags: <defaults>
</compile_context>

<pallas_src>
import functools
import math
from operator import mul
from functools import reduce

import jax
import jax.numpy as jnp
from jax.experimental import pallas as pl
from jax.experimental.pallas import tpu as pltpu


def _vae_kernel(
    # inputs (batch-blocked)
    x_ref, eps_ref, u_ref,
    # weights / biases (VMEM-resident across grid steps)
    w1_ref, b1_ref, w2_ref, b2_ref,
    wms_ref, bms_ref,
    wd1_ref, bd1_ref, wd2_ref, bd2_ref,
    # outputs
    logits_ref, samp_ref, lat_ref,
    *, latent_size,
):
    f32 = jnp.float32
    bf16 = jnp.bfloat16
    L = latent_size

    x = x_ref[...]                                   # bf16 (TB, F)

    # ---- Encoder hidden stack: Linear -> ReLU -> Linear -> ReLU (bf16 MXU, f32 acc) ----
    h1 = jnp.maximum(
        jnp.dot(x, w1_ref[...], preferred_element_type=f32) + b1_ref[...], 0.0)
    h0 = jnp.maximum(
        jnp.dot(h1.astype(bf16), w2_ref[...], preferred_element_type=f32)
        + b2_ref[...], 0.0)

    # ---- fused mean / log_std heads: one (H, 2L) matmul instead of two (H, L) ----
    ms = jnp.dot(h0.astype(bf16), wms_ref[...], preferred_element_type=f32) + bms_ref[...]
    mean = ms[:, :L]
    std = jnp.exp(0.5 * ms[:, L:])

    # ---- reparameterization: z = mean + eps * std ----
    z = mean + eps_ref[...] * std

    # ---- Decoder: Linear -> ReLU -> Linear, then sigmoid (inside Decoder) ----
    d1 = jnp.maximum(
        jnp.dot(z.astype(bf16), wd1_ref[...], preferred_element_type=f32)
        + bd1_ref[...], 0.0)
    dec = jnp.dot(d1.astype(bf16), wd2_ref[...], preferred_element_type=f32) + bd2_ref[...]
    logits = jax.nn.sigmoid(dec)          # Decoder.__call__ returns sigmoid(...)

    # ---- VAE.decode: mean_image = sigmoid(logits); sampled ~ Bernoulli(mean_image) ----
    # mean_image itself is recomputed (trivial elementwise) outside the kernel to
    # avoid a third full (B, F) f32 writeback stream; only the bernoulli bits are
    # written here (int8).
    mean_image = jax.nn.sigmoid(logits)
    sampled_bits = (u_ref[...] < mean_image).astype(jnp.int8)

    logits_ref[...] = logits
    samp_ref[...] = sampled_bits
    lat_ref[...] = jnp.stack([z, mean, std], axis=0)   # (3, TB, L) packed latent slab


def vae_forward(x, eps, u, params, image_shape):
    """x: (B, C, H, W) float32. Returns the 6-tuple of the PyTorch forward()."""
    B = x.shape[0]
    F = reduce(mul, image_shape, 1)
    H = params["w1"].shape[1]
    L = params["wm"].shape[1]

    f32 = jnp.float32
    bf16 = jnp.bfloat16

    # ---- batch tiling: single sublane-aligned tile for small B, 256-row tiles when
    # B scales (bounds per-step VMEM, enables pipelining + megacore sharding). ----
    if B <= 256:
        TB = max(8, ((B + 7) // 8) * 8)
    else:
        TB = 256
    padded_B = ((B + TB - 1) // TB) * TB
    grid = (padded_B // TB,)

    def pad_rows(a):
        if a.shape[0] == padded_B:
            return a
        pad = ((0, padded_B - a.shape[0]),) + ((0, 0),) * (a.ndim - 1)
        return jnp.pad(a, pad)

    x_flat = pad_rows(x.reshape(B, F).astype(bf16))
    u_flat = pad_rows(u.reshape(B, F).astype(f32))
    eps_p = pad_rows(eps.astype(f32))

    # bf16 weights feed the MXU; biases stay f32 (added after f32 accumulation).
    w1 = params["w1"].astype(bf16); b1 = params["b1"].astype(f32)
    w2 = params["w2"].astype(bf16); b2 = params["b2"].astype(f32)
    wms = jnp.concatenate([params["wm"], params["ws"]], axis=1).astype(bf16)
    bms = jnp.concatenate([params["bm"], params["bs"]], axis=1).astype(f32)
    wd1 = params["wd1"].astype(bf16); bd1 = params["bd1"].astype(f32)
    wd2 = params["wd2"].astype(bf16); bd2 = params["bd2"].astype(f32)

    def batch_spec(shape):
        nrest = len(shape) - 1
        return pl.BlockSpec((TB,) + tuple(shape[1:]),
                            lambda i, _n=nrest: (i,) + (0,) * _n)

    def const_spec(shape):
        nd = len(shape)
        return pl.BlockSpec(tuple(shape), lambda i, _n=nd: (0,) * _n)

    in_arrays = (x_flat, eps_p, u_flat,
                 w1, b1, w2, b2, wms, bms, wd1, bd1, wd2, bd2)
    in_specs = [batch_spec(x_flat.shape),
                batch_spec(eps_p.shape),
                batch_spec(u_flat.shape)]
    in_specs += [const_spec(a.shape) for a in in_arrays[3:]]

    out_shapes = (
        jax.ShapeDtypeStruct((padded_B, F), f32),        # logits (= sigmoid(linear))
        jax.ShapeDtypeStruct((padded_B, F), jnp.int8),   # bernoulli bits
        jax.ShapeDtypeStruct((3, padded_B, L), f32),     # packed [z | mean | std]
    )
    out_specs = [
        pl.BlockSpec((TB, F), lambda i: (i, 0)),
        pl.BlockSpec((TB, F), lambda i: (i, 0)),
        pl.BlockSpec((3, TB, L), lambda i: (0, i, 0)),
    ]

    # advisory cost estimate for the XLA scheduler
    flops = 2 * padded_B * (F * H + H * H + H * 2 * L + L * H + H * F)
    transcendentals = padded_B * (L + 2 * F)
    bytes_accessed = (
        sum(a.size * a.dtype.itemsize for a in in_arrays)
        + sum(math.prod(s.shape) * jnp.dtype(s.dtype).itemsize for s in out_shapes)
    )

    call = pl.pallas_call(
        functools.partial(_vae_kernel, latent_size=L),
        grid_spec=pltpu.PrefetchScalarGridSpec(
            num_scalar_prefetch=0,
            grid=grid,
            in_specs=in_specs,
            out_specs=out_specs,
        ),
        out_shape=out_shapes,
        compiler_params=pltpu.CompilerParams(
            # independent batch tiles -> shardable across v7x's 2 TensorCores
            dimension_semantics=("parallel",),
        ),
        cost_estimate=pl.CostEstimate(
            flops=flops,
            transcendentals=transcendentals,
            bytes_accessed=bytes_accessed,
        ),
    )
    logits_p, bits_p, lat_p = call(*in_arrays)

    logits = logits_p[:B]
    mean_image = jax.nn.sigmoid(logits)            # VAE.decode's second sigmoid (cheap, outside kernel)
    sampled = bits_p[:B].astype(f32)               # torch.bernoulli returns float
    z = lat_p[0, :B]
    mean = lat_p[1, :B]
    std = lat_p[2, :B]

    logits = logits.reshape(B, *image_shape)
    mean_image = mean_image.reshape(B, *image_shape)
    sampled = sampled.reshape(B, *image_shape)
    # forward() returns (mean_image, sampled_image, logits, z, mean, stddev)
    return mean_image, sampled, logits, z, mean, std


def init_params(key, flat_features, hid_size, latent_size):
    """Deterministic synthetic weights. Stored as (in, out) so kernel does x @ W + b
    (equivalent to torch's x @ W.T + b with W of shape (out, in))."""
    ks = jax.random.split(key, 8)

    def lin(k, fan_in, fan_out):
        kw, kb = jax.random.split(k)
        bound = 1.0 / jnp.sqrt(fan_in)
        w = jax.random.uniform(kw, (fan_in, fan_out), jnp.float32, -bound, bound)
        b = jax.random.uniform(kb, (1, fan_out), jnp.float32, -bound, bound)
        return w, b

    w1, b1 = lin(ks[0], flat_features, hid_size)
    w2, b2 = lin(ks[1], hid_size, hid_size)
    wm, bm = lin(ks[2], hid_size, latent_size)
    ws, bs = lin(ks[3], hid_size, latent_size)
    wd1, bd1 = lin(ks[4], latent_size, hid_size)
    wd2, bd2 = lin(ks[5], hid_size, flat_features)
    return dict(w1=w1, b1=b1, w2=w2, b2=b2, wm=wm, bm=bm, ws=ws, bs=bs,
                wd1=wd1, bd1=bd1, wd2=wd2, bd2=bd2)


if __name__ == "__main__":
    # Small shapes consistent with the module: VAE(image_shape=(4,16,16),
    # hid_size=64, latent_size=2), batch=2.
    image_shape = (4, 16, 16)
    B = 2
    hid_size = 64
    latent_size = 2
    F = reduce(mul, image_shape, 1)

    root = jax.random.PRNGKey(0)
    k_params, k_x, k_eps, k_u = jax.random.split(root, 4)

    params = init_params(k_params, F, hid_size, latent_size)
    x = jax.random.uniform(k_x, (B, *image_shape), jnp.float32)     # input image batch
    eps = jax.random.normal(k_eps, (B, latent_size), jnp.float32)   # randn_like(stddev)
    u = jax.random.uniform(k_u, (B, *image_shape), jnp.float32)     # bernoulli uniforms

    fwd = jax.jit(functools.partial(vae_forward, image_shape=image_shape))
    mean_image, sampled_image, logits, z, mean, stddev = fwd(x, eps, u, params)
    jax.block_until_ready((mean_image, sampled_image, logits, z, mean, stddev))

    # light sanity checks
    assert mean_image.shape == (B, *image_shape)
    assert sampled_image.shape == (B, *image_shape)
    assert logits.shape == (B, *image_shape)
    assert z.shape == (B, latent_size)
    assert mean.shape == (B, latent_size)
    assert stddev.shape == (B, latent_size)
    assert bool(jnp.all(jnp.isfinite(mean_image)))
    assert bool(jnp.all((sampled_image == 0.0) | (sampled_image == 1.0)))
    assert bool(jnp.all(stddev > 0.0))

    print("KERNEL_OK")
</pallas_src>

<mosaic_0001>
module attributes {stable_mosaic.version = 11 : i64} {
  func.func @_vae_kernel(%arg0: i32, %arg1: memref<8x1024xbf16, #tpu.memory_space<vmem>>, %arg2: memref<8x2xf32, #tpu.memory_space<vmem>>, %arg3: memref<8x1024xf32, #tpu.memory_space<vmem>>, %arg4: memref<1024x64xbf16, #tpu.memory_space<vmem>>, %arg5: memref<1x64xf32, #tpu.memory_space<vmem>>, %arg6: memref<64x64xbf16, #tpu.memory_space<vmem>>, %arg7: memref<1x64xf32, #tpu.memory_space<vmem>>, %arg8: memref<64x4xbf16, #tpu.memory_space<vmem>>, %arg9: memref<1x4xf32, #tpu.memory_space<vmem>>, %arg10: memref<2x64xbf16, #tpu.memory_space<vmem>>, %arg11: memref<1x64xf32, #tpu.memory_space<vmem>>, %arg12: memref<64x1024xbf16, #tpu.memory_space<vmem>>, %arg13: memref<1x1024xf32, #tpu.memory_space<vmem>>, %arg14: memref<8x1024xf32, #tpu.memory_space<vmem>>, %arg15: memref<8x1024xi8, #tpu.memory_space<vmem>>, %arg16: memref<3x8x2xf32, #tpu.memory_space<vmem>>) attributes {dimension_semantics = [#tpu.dimension_semantics<parallel>], iteration_bounds = array<i64: 1>, scalar_prefetch = 0 : i64, scratch_operands = 0 : i64, tpu.core_type = #tpu.core_type<tc>, window_params = [{transform_indices = @transform_0, window_bounds = array<i64: 8, 1024>}, {transform_indices = @transform_1, window_bounds = array<i64: 8, 2>}, {transform_indices = @transform_2, window_bounds = array<i64: 8, 1024>}, {pipeline_mode = #tpu.pipeline_mode<synchronous>, transform_indices = @transform_3, window_bounds = array<i64: 1024, 64>}, {pipeline_mode = #tpu.pipeline_mode<synchronous>, transform_indices = @transform_4, window_bounds = array<i64: 1, 64>}, {pipeline_mode = #tpu.pipeline_mode<synchronous>, transform_indices = @transform_5, window_bounds = array<i64: 64, 64>}, {pipeline_mode = #tpu.pipeline_mode<synchronous>, transform_indices = @transform_6, window_bounds = array<i64: 1, 64>}, {pipeline_mode = #tpu.pipeline_mode<synchronous>, transform_indices = @transform_7, window_bounds = array<i64: 64, 4>}, {pipeline_mode = #tpu.pipeline_mode<synchronous>, transform_indices = @transform_8, window_bounds = array<i64: 1, 4>}, {pipeline_mode = #tpu.pipeline_mode<synchronous>, transform_indices = @transform_9, window_bounds = array<i64: 2, 64>}, {pipeline_mode = #tpu.pipeline_mode<synchronous>, transform_indices = @transform_10, window_bounds = array<i64: 1, 64>}, {pipeline_mode = #tpu.pipeline_mode<synchronous>, transform_indices = @transform_11, window_bounds = array<i64: 64, 1024>}, {pipeline_mode = #tpu.pipeline_mode<synchronous>, transform_indices = @transform_12, window_bounds = array<i64: 1, 1024>}, {transform_indices = @transform_13, window_bounds = array<i64: 8, 1024>}, {transform_indices = @transform_14, window_bounds = array<i64: 8, 1024>}, {transform_indices = @transform_15, window_bounds = array<i64: 3, 8, 2>}]} {
    %c0 = arith.constant 0 : index
    %c0_0 = arith.constant 0 : index
    %0 = vector.load %arg1[%c0, %c0_0] : memref<8x1024xbf16, #tpu.memory_space<vmem>>, vector<8x1024xbf16>
    %c0_1 = arith.constant 0 : index
    %c0_2 = arith.constant 0 : index
    %1 = vector.load %arg4[%c0_1, %c0_2] : memref<1024x64xbf16, #tpu.memory_space<vmem>>, vector<1024x64xbf16>
    %cst = arith.constant dense<0.000000e+00> : vector<8x64xf32>
    %2 = tpu.matmul %0, %1, %cst {dimension_numbers = #tpu.dot_dimension_numbers<[1], [0], [0], [1], [0, 0, 1, 1], [], []>} : vector<8x1024xbf16>, vector<1024x64xbf16>, vector<8x64xf32> -> vector<8x64xf32>
    %c0_3 = arith.constant 0 : index
    %c0_4 = arith.constant 0 : index
    %3 = vector.load %arg5[%c0_3, %c0_4] : memref<1x64xf32, #tpu.memory_space<vmem>>, vector<1x64xf32>
    %4 = vector.broadcast %3 : vector<1x64xf32> to vector<8x64xf32>
    %5 = arith.addf %2, %4 : vector<8x64xf32>
    %cst_5 = arith.constant 0.000000e+00 : f32
    %6 = vector.broadcast %cst_5 : f32 to vector<8x64xf32>
    %7 = arith.maximumf %5, %6 : vector<8x64xf32>
    %8 = arith.truncf %7 : vector<8x64xf32> to vector<8x64xbf16>
    %c0_6 = arith.constant 0 : index
    %c0_7 = arith.constant 0 : index
    %9 = vector.load %arg6[%c0_6, %c0_7] : memref<64x64xbf16, #tpu.memory_space<vmem>>, vector<64x64xbf16>
    %cst_8 = arith.constant dense<0.000000e+00> : vector<8x64xf32>
    %10 = tpu.matmul %8, %9, %cst_8 {dimension_numbers = #tpu.dot_dimension_numbers<[1], [0], [0], [1], [0, 0, 1, 1], [], []>} : vector<8x64xbf16>, vector<64x64xbf16>, vector<8x64xf32> -> vector<8x64xf32>
    %c0_9 = arith.constant 0 : index
    %c0_10 = arith.constant 0 : index
    %11 = vector.load %arg7[%c0_9, %c0_10] : memref<1x64xf32, #tpu.memory_space<vmem>>, vector<1x64xf32>
    %12 = vector.broadcast %11 : vector<1x64xf32> to vector<8x64xf32>
    %13 = arith.addf %10, %12 : vector<8x64xf32>
    %cst_11 = arith.constant 0.000000e+00 : f32
    %14 = vector.broadcast %cst_11 : f32 to vector<8x64xf32>
    %15 = arith.maximumf %13, %14 : vector<8x64xf32>
    %16 = arith.truncf %15 : vector<8x64xf32> to vector<8x64xbf16>
    %c0_12 = arith.constant 0 : index
    %c0_13 = arith.constant 0 : index
    %17 = vector.load %arg8[%c0_12, %c0_13] : memref<64x4xbf16, #tpu.memory_space<vmem>>, vector<64x4xbf16>
    %cst_14 = arith.constant dense<0.000000e+00> : vector<8x4xf32>
    %18 = tpu.matmul %16, %17, %cst_14 {dimension_numbers = #tpu.dot_dimension_numbers<[1], [0], [0], [1], [0, 0, 1, 1], [], []>} : vector<8x64xbf16>, vector<64x4xbf16>, vector<8x4xf32> -> vector<8x4xf32>
    %c0_15 = arith.constant 0 : index
    %c0_16 = arith.constant 0 : index
    %19 = vector.load %arg9[%c0_15, %c0_16] : memref<1x4xf32, #tpu.memory_space<vmem>>, vector<1x4xf32>
    %20 = vector.broadcast %19 : vector<1x4xf32> to vector<8x4xf32>
    %21 = arith.addf %18, %20 : vector<8x4xf32>
    %22 = vector.extract_strided_slice %21 {offsets = [0, 0], sizes = [8, 2], strides = [1, 1]} : vector<8x4xf32> to vector<8x2xf32>
    %23 = vector.extract_strided_slice %21 {offsets = [0, 2], sizes = [8, 2], strides = [1, 1]} : vector<8x4xf32> to vector<8x2xf32>
    %cst_17 = arith.constant 5.000000e-01 : f32
    %24 = vector.broadcast %cst_17 : f32 to vector<8x2xf32>
    %25 = arith.mulf %24, %23 : vector<8x2xf32>
    %26 = math.exp %25 : vector<8x2xf32>
    %c0_18 = arith.constant 0 : index
    %c0_19 = arith.constant 0 : index
    %27 = vector.load %arg2[%c0_18, %c0_19] : memref<8x2xf32, #tpu.memory_space<vmem>>, vector<8x2xf32>
    %28 = arith.mulf %27, %26 : vector<8x2xf32>
    %29 = arith.addf %22, %28 : vector<8x2xf32>
    %30 = arith.truncf %29 : vector<8x2xf32> to vector<8x2xbf16>
    %c0_20 = arith.constant 0 : index
    %c0_21 = arith.constant 0 : index
    %31 = vector.load %arg10[%c0_20, %c0_21] : memref<2x64xbf16, #tpu.memory_space<vmem>>, vector<2x64xbf16>
    %cst_22 = arith.constant dense<0.000000e+00> : vector<8x64xf32>
    %32 = tpu.matmul %30, %31, %cst_22 {dimension_numbers = #tpu.dot_dimension_numbers<[1], [0], [0], [1], [0, 0, 1, 1], [], []>} : vector<8x2xbf16>, vector<2x64xbf16>, vector<8x64xf32> -> vector<8x64xf32>
    %c0_23 = arith.constant 0 : index
    %c0_24 = arith.constant 0 : index
    %33 = vector.load %arg11[%c0_23, %c0_24] : memref<1x64xf32, #tpu.memory_space<vmem>>, vector<1x64xf32>
    %34 = vector.broadcast %33 : vector<1x64xf32> to vector<8x64xf32>
    %35 = arith.addf %32, %34 : vector<8x64xf32>
    %cst_25 = arith.constant 0.000000e+00 : f32
    %36 = vector.broadcast %cst_25 : f32 to vector<8x64xf32>
    %37 = arith.maximumf %35, %36 : vector<8x64xf32>
    %38 = arith.truncf %37 : vector<8x64xf32> to vector<8x64xbf16>
    %c0_26 = arith.constant 0 : index
    %c0_27 = arith.constant 0 : index
    %39 = vector.load %arg12[%c0_26, %c0_27] : memref<64x1024xbf16, #tpu.memory_space<vmem>>, vector<64x1024xbf16>
    %cst_28 = arith.constant dense<0.000000e+00> : vector<8x1024xf32>
    %40 = tpu.matmul %38, %39, %cst_28 {dimension_numbers = #tpu.dot_dimension_numbers<[1], [0], [0], [1], [0, 0, 1, 1], [], []>} : vector<8x64xbf16>, vector<64x1024xbf16>, vector<8x1024xf32> -> vector<8x1024xf32>
    %c0_29 = arith.constant 0 : index
    %c0_30 = arith.constant 0 : index
    %41 = vector.load %arg13[%c0_29, %c0_30] : memref<1x1024xf32, #tpu.memory_space<vmem>>, vector<1x1024xf32>
    %42 = vector.broadcast %41 : vector<1x1024xf32> to vector<8x1024xf32>
    %43 = arith.addf %40, %42 : vector<8x1024xf32>
    %44 = arith.negf %43 : vector<8x1024xf32>
    %45 = math.exp %44 : vector<8x1024xf32>
    %cst_31 = arith.constant 1.000000e+00 : f32
    %46 = vector.broadcast %cst_31 : f32 to vector<8x1024xf32>
    %47 = arith.addf %46, %45 : vector<8x1024xf32>
    %48 = arith.divf %46, %47 : vector<8x1024xf32>
    %49 = arith.negf %48 : vector<8x1024xf32>
    %50 = math.exp %49 : vector<8x1024xf32>
    %cst_32 = arith.constant 1.000000e+00 : f32
    %51 = vector.broadcast %cst_32 : f32 to vector<8x1024xf32>
    %52 = arith.addf %51, %50 : vector<8x1024xf32>
    %53 = arith.divf %51, %52 : vector<8x1024xf32>
    %c0_33 = arith.constant 0 : index
    %c0_34 = arith.constant 0 : index
    %54 = vector.load %arg3[%c0_33, %c0_34] : memref<8x1024xf32, #tpu.memory_space<vmem>>, vector<8x1024xf32>
    %55 = arith.cmpf olt, %54, %53 : vector<8x1024xf32>
    %56 = arith.extui %55 : vector<8x1024xi1> to vector<8x1024xi8>
    %c0_35 = arith.constant 0 : index
    %c0_36 = arith.constant 0 : index
    %57 = vector.load %arg14[%c0_35, %c0_36] : memref<8x1024xf32, #tpu.memory_space<vmem>>, vector<8x1024xf32>
    tpu.vector_store %arg14[%c0_35, %c0_36], %48 {strides = array<i32>} : memref<8x1024xf32, #tpu.memory_space<vmem>>, vector<8x1024xf32>,
    %c0_37 = arith.constant 0 : index
    %c0_38 = arith.constant 0 : index
    %58 = vector.load %arg15[%c0_37, %c0_38] : memref<8x1024xi8, #tpu.memory_space<vmem>>, vector<8x1024xi8>
    tpu.vector_store %arg15[%c0_37, %c0_38], %56 {strides = array<i32>} : memref<8x1024xi8, #tpu.memory_space<vmem>>, vector<8x1024xi8>,
    %59 = vector.shape_cast %29 : vector<8x2xf32> to vector<1x8x2xf32>
    %60 = vector.shape_cast %22 : vector<8x2xf32> to vector<1x8x2xf32>
    %61 = vector.shape_cast %26 : vector<8x2xf32> to vector<1x8x2xf32>
    %62 = tpu.concatenate %59, %60, %61 in 0 : vector<1x8x2xf32>, vector<1x8x2xf32>, vector<1x8x2xf32> -> vector<3x8x2xf32>
    %c0_39 = arith.constant 0 : index
    %c0_40 = arith.constant 0 : index
    %c0_41 = arith.constant 0 : index
    %63 = vector.load %arg16[%c0_39, %c0_40, %c0_41] : memref<3x8x2xf32, #tpu.memory_space<vmem>>, vector<3x8x2xf32>
    tpu.vector_store %arg16[%c0_39, %c0_40, %c0_41], %62 {strides = array<i32>} : memref<3x8x2xf32, #tpu.memory_space<vmem>>, vector<3x8x2xf32>,
    return
  }
  func.func @transform_0(%arg0: i32) -> (i32, i32) {
    %c0_i32 = arith.constant 0 : i32
    %c0_i32_0 = arith.constant 0 : i32
    return %arg0, %c0_i32 : i32, i32
  }
  func.func @transform_1(%arg0: i32) -> (i32, i32) {
    %c0_i32 = arith.constant 0 : i32
    %c0_i32_0 = arith.constant 0 : i32
    return %arg0, %c0_i32 : i32, i32
  }
  func.func @transform_2(%arg0: i32) -> (i32, i32) {
    %c0_i32 = arith.constant 0 : i32
    %c0_i32_0 = arith.constant 0 : i32
    return %arg0, %c0_i32 : i32, i32
  }
  func.func @transform_3(%arg0: i32) -> (i32, i32) {
    %c0_i32 = arith.constant 0 : i32
    %c0_i32_0 = arith.constant 0 : i32
    %c0_i32_1 = arith.constant 0 : i32
    return %c0_i32, %c0_i32_0 : i32, i32
  }
  func.func @transform_4(%arg0: i32) -> (i32, i32) {
    %c0_i32 = arith.constant 0 : i32
    %c0_i32_0 = arith.constant 0 : i32
    %c0_i32_1 = arith.constant 0 : i32
    return %c0_i32, %c0_i32_0 : i32, i32
  }
  func.func @transform_5(%arg0: i32) -> (i32, i32) {
    %c0_i32 = arith.constant 0 : i32
    %c0_i32_0 = arith.constant 0 : i32
    %c0_i32_1 = arith.constant 0 : i32
    return %c0_i32, %c0_i32_0 : i32, i32
  }
  func.func @transform_6(%arg0: i32) -> (i32, i32) {
    %c0_i32 = arith.constant 0 : i32
    %c0_i32_0 = arith.constant 0 : i32
    %c0_i32_1 = arith.constant 0 : i32
    return %c0_i32, %c0_i32_0 : i32, i32
  }
  func.func @transform_7(%arg0: i32) -> (i32, i32) {
    %c0_i32 = arith.constant 0 : i32
    %c0_i32_0 = arith.constant 0 : i32
    %c0_i32_1 = arith.constant 0 : i32
    return %c0_i32, %c0_i32_0 : i32, i32
  }
  func.func @transform_8(%arg0: i32) -> (i32, i32) {
    %c0_i32 = arith.constant 0 : i32
    %c0_i32_0 = arith.constant 0 : i32
    %c0_i32_1 = arith.constant 0 : i32
    return %c0_i32, %c0_i32_0 : i32, i32
  }
  func.func @transform_9(%arg0: i32) -> (i32, i32) {
    %c0_i32 = arith.constant 0 : i32
    %c0_i32_0 = arith.constant 0 : i32
    %c0_i32_1 = arith.constant 0 : i32
    return %c0_i32, %c0_i32_0 : i32, i32
  }
  func.func @transform_10(%arg0: i32) -> (i32, i32) {
    %c0_i32 = arith.constant 0 : i32
    %c0_i32_0 = arith.constant 0 : i32
    %c0_i32_1 = arith.constant 0 : i32
    return %c0_i32, %c0_i32_0 : i32, i32
  }
  func.func @transform_11(%arg0: i32) -> (i32, i32) {
    %c0_i32 = arith.constant 0 : i32
    %c0_i32_0 = arith.constant 0 : i32
    %c0_i32_1 = arith.constant 0 : i32
    return %c0_i32, %c0_i32_0 : i32, i32
  }
  func.func @transform_12(%arg0: i32) -> (i32, i32) {
    %c0_i32 = arith.constant 0 : i32
    %c0_i32_0 = arith.constant 0 : i32
    %c0_i32_1 = arith.constant 0 : i32
    return %c0_i32, %c0_i32_0 : i32, i32
  }
  func.func @transform_13(%arg0: i32) -> (i32, i32) {
    %c0_i32 = arith.constant 0 : i32
    %c0_i32_0 = arith.constant 0 : i32
    return %arg0, %c0_i32 : i32, i32
  }
  func.func @transform_14(%arg0: i32) -> (i32, i32) {
    %c0_i32 = arith.constant 0 : i32
    %c0_i32_0 = arith.constant 0 : i32
    return %arg0, %c0_i32 : i32, i32
  }
  func.func @transform_15(%arg0: i32) -> (i32, i32, i32) {
    %c0_i32 = arith.constant 0 : i32
    %c0_i32_0 = arith.constant 0 : i32
    %c0_i32_1 = arith.constant 0 : i32
    return %c0_i32, %arg0, %c0_i32_0 : i32, i32, i32
  }
}

</mosaic_0001>

<bundles_post_ra>
// kernel: vae_forward.1
= control target key start
LH: loop header
LB: loop body
LE: loop exit
PB: predicated region body
PF: predicated region fallthrough
CT: control target
= control target key end

     0   :  { %vm1995_vm0 = vmmov 0   ;;  %vm802_vm1 = vcmask 523264   ;;  %vm953_vm2 = vcmask 1040384   ;;  %vm949_vm3 = vcmask 15360   ;;  %s2511_s3 = inlined_call_operand.vmem [shape: bf16[1024,64], index: 3, kind: input, shape index: {}]   ;;  %s2512_s0 = inlined_call_operand.vmem [shape: bf16[8,1024], index: 0, kind: input, shape index: {}]   ;;  %s2513_s5 = inlined_call_operand.vmem [shape: bf16[64,64], index: 5, kind: input, shape index: {}]   ;;  %s2514_s7 = inlined_call_operand.vmem [shape: bf16[64,4], index: 7, kind: input, shape index: {}]   ;;  %s2515_s4 = inlined_call_operand.vmem [shape: f32[1,64], index: 4, kind: input, shape index: {}]   ;;  %s2516_s6 = inlined_call_operand.vmem [shape: f32[1,64], index: 6, kind: input, shape index: {}]   ;;  %s2517_s9 = inlined_call_operand.vmem [shape: bf16[2,64], index: 9, kind: input, shape index: {}]   ;;  %s2518_s8 = inlined_call_operand.vmem [shape: f32[1,4], index: 8, kind: input, shape index: {}]   ;;  %s2519_s15 = inlined_call_operand.vmem [shape: f32[3,8,2], index: 15, kind: output, shape index: {2}]   ;;  %s2520_s11 = inlined_call_operand.vmem [shape: bf16[64,1024], index: 11, kind: input, shape index: {}]   ;;  %s2521_s1 = inlined_call_operand.vmem [shape: f32[8,2], index: 1, kind: input, shape index: {}]   ;;  %s2522_s10 = inlined_call_operand.vmem [shape: f32[1,64], index: 10, kind: input, shape index: {}]   ;;  %s2523_s12 = inlined_call_operand.vmem [shape: f32[1,1024], index: 12, kind: input, shape index: {}]   ;;  %s2524_s13 = inlined_call_operand.vmem [shape: f32[8,1024], index: 13, kind: output, shape index: {0}]   ;;  %s2525_s2 = inlined_call_operand.vmem [shape: f32[8,1024], index: 2, kind: input, shape index: {}]   ;;  %s2526_s14 = inlined_call_operand.vmem [shape: s8[8,1024], index: 14, kind: output, shape index: {1}]  }
   0x1   :  { %v1848_v0 = vld [vmem:[%s2511_s3 + $0x40] sm:$0xff]   ;;  %v1852_v4 = vld [vmem:[%s2511_s3 + $0x48] sm:$0xff]   ;;  %v1856_v8 = vld [vmem:[%s2511_s3 + $0x50] sm:$0xff]  }
   0x2   :  { %v1849_v1 = vld [vmem:[%s2511_s3 + $0xc0] sm:$0xff]   ;;  %1714 = vmatprep.subr.bf16.mxu0 %v1848_v0  ;;  %v1853_v5 = vld [vmem:[%s2511_s3 + $0xc8] sm:$0xff]   ;;  %v1857_v9 = vld [vmem:[%s2511_s3 + $0xd0] sm:$0xff]  }
   0x3   :  { %v1850_v2 = vld [vmem:[%s2511_s3] sm:$0xff]   ;;  %1736 = vmatprep.subr.bf16.mxu1 %v1849_v1  ;;  %v1854_v6 = vld [vmem:[%s2511_s3 + $0x8] sm:$0xff]   ;;  %v1858_v10 = vld [vmem:[%s2511_s3 + $0x10] sm:$0xff]  }
   0x4   :  { %v1851_v3 = vld [vmem:[%s2511_s3 + $0x80] sm:$0xff]   ;;  %1715 = vmatpush3.bf16.msra.mxu0 %v1850_v2  ;;  %v1855_v7 = vld [vmem:[%s2511_s3 + $0x88] sm:$0xff]   ;;  %v1859_v11 = vld [vmem:[%s2511_s3 + $0x90] sm:$0xff]  }
   0x5   :  { %1737 = vmatpush3.bf16.msra.mxu1 %v1851_v3  ;;  %1716 = vmatprep.subr.bf16.mxu0 %v1852_v4  ;;  %v1860_v12 = vld [vmem:[%s2511_s3 + $0x58] sm:$0xff]   ;;  %v1864_v16 = vld [vmem:[%s2511_s3 + $0x60] sm:$0xff]   ;;  %v1868_v20 = vld [vmem:[%s2511_s3 + $0x68] sm:$0xff]  }
   0x6   :  { %1738 = vmatprep.subr.bf16.mxu1 %v1853_v5  ;;  %v1861_v13 = vld [vmem:[%s2511_s3 + $0xd8] sm:$0xff]   ;;  %v1865_v17 = vld [vmem:[%s2511_s3 + $0xe0] sm:$0xff]   ;;  %v1869_v21 = vld [vmem:[%s2511_s3 + $0xe8] sm:$0xff]  }
   0x7   :  { %v1862_v14 = vld [vmem:[%s2511_s3 + $0x18] sm:$0xff]   ;;  %v1866_v18 = vld [vmem:[%s2511_s3 + $0x20] sm:$0xff]   ;;  %v1870_v22 = vld [vmem:[%s2511_s3 + $0x28] sm:$0xff]  }
   0x8   :  { %1717 = vmatpush3.bf16.msra.mxu0 %v1854_v6  ;;  %v1863_v15 = vld [vmem:[%s2511_s3 + $0x98] sm:$0xff]   ;;  %v1867_v19 = vld [vmem:[%s2511_s3 + $0xa0] sm:$0xff]   ;;  %v1871_v23 = vld [vmem:[%s2511_s3 + $0xa8] sm:$0xff]  }
   0x9   :  { %1739 = vmatpush3.bf16.msra.mxu1 %v1855_v7  ;;  %1718 = vmatprep.subr.bf16.mxu0 %v1856_v8  ;;  %v1872_v24 = vld [vmem:[%s2511_s3 + $0x70] sm:$0xff]   ;;  %v1876_v28 = vld [vmem:[%s2511_s3 + $0x78] sm:$0xff]   ;;  %v50_v32 = vld [vmem:[%s2512_s0] sm:$0xff] }
   0xa   :  { %1740 = vmatprep.subr.bf16.mxu1 %v1857_v9  ;;  %v1873_v25 = vld [vmem:[%s2511_s3 + $0xf0] sm:$0xff]   ;;  %v1877_v29 = vld [vmem:[%s2511_s3 + $0xf8] sm:$0xff]   ;;  %v51_v33 = vld [vmem:[%s2512_s0 + $0x8] sm:$0xff]  ;;  %v1576_v34 = vcombine.low %v50_v32, %v50_v32  ;;  %v1577_v35 = vcombine.high %v50_v32, %v50_v32 }
   0xb   :  { %v1874_v26 = vld [vmem:[%s2511_s3 + $0x30] sm:$0xff]   ;;  %v1878_v30 = vld [vmem:[%s2511_s3 + $0x38] sm:$0xff]   ;;  %v1578_v36 = vcombine.low %v51_v33, %v51_v33  ;;  %v1579_v37 = vcombine.high %v51_v33, %v51_v33  ;;  %v1884_v38 = vld [vmem:[%s2511_s3 + $0x140] sm:$0xff]  }
   0xc   :  { %1719 = vmatpush3.bf16.msra.mxu0 %v1858_v10  ;;  %v1875_v27 = vld [vmem:[%s2511_s3 + $0xb0] sm:$0xff]   ;;  %v1879_v31 = vld [vmem:[%s2511_s3 + $0xb8] sm:$0xff]   ;;  %v1885_v39 = vld [vmem:[%s2511_s3 + $0x1c0] sm:$0xff]   ;;  %633 = vmatprep.mubr.bf16.mxu0 %v1577_v35 }
   0xd   :  { %1741 = vmatpush3.bf16.msra.mxu1 %v1859_v11  ;;  %1720 = vmatprep.subr.bf16.mxu0 %v1860_v12  ;;  %v1886_v40 = vld [vmem:[%s2511_s3 + $0x100] sm:$0xff]   ;;  %v1888_v42 = vld [vmem:[%s2511_s3 + $0x148] sm:$0xff]   ;;  %v1892_v46 = vld [vmem:[%s2511_s3 + $0x150] sm:$0xff]   ;;  %v1994_v12 = vmov 0.0  }
   0xe   :  { %1742 = vmatprep.subr.bf16.mxu1 %v1861_v13  ;;  %673 = vmatprep.mubr.bf16.mxu1 %v1579_v37  ;;  %v1887_v41 = vld [vmem:[%s2511_s3 + $0x180] sm:$0xff]   ;;  %v1889_v43 = vld [vmem:[%s2511_s3 + $0x1c8] sm:$0xff]   ;;  %v1893_v47 = vld [vmem:[%s2511_s3 + $0x1d0] sm:$0xff]  }
   0xf   :  { %v1890_v44 = vld [vmem:[%s2511_s3 + $0x108] sm:$0xff]   ;;  %v1894_v48 = vld [vmem:[%s2511_s3 + $0x110] sm:$0xff]   ;;  %v1896_v50 = vld [vmem:[%s2511_s3 + $0x158] sm:$0xff]  }
  0x10   :  { %1721 = vmatpush3.bf16.msra.mxu0 %v1862_v14  ;;  %v1891_v45 = vld [vmem:[%s2511_s3 + $0x188] sm:$0xff]   ;;  %v1895_v49 = vld [vmem:[%s2511_s3 + $0x190] sm:$0xff]   ;;  %v1897_v51 = vld [vmem:[%s2511_s3 + $0x1d8] sm:$0xff]  }
  0x11   :  { %1743 = vmatpush3.bf16.msra.mxu1 %v1863_v15  ;;  %1722 = vmatprep.subr.bf16.mxu0 %v1864_v16  ;;  %v1898_v52 = vld [vmem:[%s2511_s3 + $0x118] sm:$0xff]   ;;  %v1900_v54 = vld [vmem:[%s2511_s3 + $0x160] sm:$0xff]   ;;  %v1904_v58 = vld [vmem:[%s2511_s3 + $0x168] sm:$0xff]  }
  0x12   :  { %1744 = vmatprep.subr.bf16.mxu1 %v1865_v17  ;;  %v1899_v53 = vld [vmem:[%s2511_s3 + $0x198] sm:$0xff]   ;;  %v1901_v55 = vld [vmem:[%s2511_s3 + $0x1e0] sm:$0xff]   ;;  %v1905_v59 = vld [vmem:[%s2511_s3 + $0x1e8] sm:$0xff]  }
  0x13   :  { %v1902_v56 = vld [vmem:[%s2511_s3 + $0x120] sm:$0xff]   ;;  %v1906_v60 = vld [vmem:[%s2511_s3 + $0x128] sm:$0xff]   ;;  %v1908_v62 = vld [vmem:[%s2511_s3 + $0x170] sm:$0xff]  }
  0x14   :  { %1723 = vmatpush3.bf16.msra.mxu0 %v1866_v18  ;;  %v1903_v57 = vld [vmem:[%s2511_s3 + $0x1a0] sm:$0xff]   ;;  %v1907_v61 = vld [vmem:[%s2511_s3 + $0x1a8] sm:$0xff]   ;;  %v1909_v63 = vld [vmem:[%s2511_s3 + $0x1f0] sm:$0xff]  }
  0x15   :  { %1745 = vmatpush3.bf16.msra.mxu1 %v1867_v19  ;;  %1724 = vmatprep.subr.bf16.mxu0 %v1868_v20  ;;  %v1910_v0 = vld [vmem:[%s2511_s3 + $0x130] sm:$0xff]   ;;  %v1912_v2 = vld [vmem:[%s2511_s3 + $0x178] sm:$0xff]   ;;  %v1920_v13 = vld [vmem:[%s2513_s5] sm:$0xff]  }
  0x16   :  { %1746 = vmatprep.subr.bf16.mxu1 %v1869_v21  ;;  %v1911_v1 = vld [vmem:[%s2511_s3 + $0x1b0] sm:$0xff]   ;;  %v1913_v3 = vld [vmem:[%s2511_s3 + $0x1f8] sm:$0xff]   ;;  %v1921_v14 = vld [vmem:[%s2513_s5 + $0x8] sm:$0xff]  }
  0x17   :  { %v1914_v4 = vld [vmem:[%s2511_s3 + $0x138] sm:$0xff]   ;;  %v52_v6 = vld [vmem:[%s2512_s0 + $0x10] sm:$0xff]  ;;  %v1924_v17 = vld [vmem:[%s2514_s7] sm:$0xff]  }
  0x18   :  { %1725 = vmatpush3.bf16.msra.mxu0 %v1870_v22  ;;  %v1915_v5 = vld [vmem:[%s2511_s3 + $0x1b8] sm:$0xff]   ;;  %v1580_v7 = vcombine.low %v52_v6, %v52_v6  ;;  %v1581_v8 = vcombine.high %v52_v6, %v52_v6  ;;  %v1922_v15 = vld [vmem:[%s2513_s5 + $0x10] sm:$0xff]   ;;  %v1925_v18 = vld [vmem:[%s2514_s7 + $0x8] sm:$0xff]   ;;  %s1996_s3 = smov 126  }
  0x19   :  { %1747 = vmatpush3.bf16.msra.mxu1 %v1871_v23  ;;  %1726 = vmatprep.subr.bf16.mxu0 %v1872_v24  ;;  %v53_v9 = vld [vmem:[%s2512_s0 + $0x18] sm:$0xff]  ;;  %v1575_v21 = vld [vmem:[%s2515_s4] ss:$0 sm:$0xff] }
  0x1a   :  { %1748 = vmatprep.subr.bf16.mxu1 %v1873_v25  ;;  %v1582_v10 = vcombine.low %v53_v9, %v53_v9  ;;  %v1583_v11 = vcombine.high %v53_v9, %v53_v9  ;;  %v1923_v16 = vld [vmem:[%s2513_s5 + $0x18] sm:$0xff]   ;;  %v1011_v9 = vld [vmem:[%s2520_s11 + $0x60] sm:$0xff] }
  0x1c   :  { %1727 = vmatpush3.bf16.msra.mxu0 %v1874_v26 }
  0x1d   :  { %1749 = vmatpush3.bf16.msra.mxu1 %v1875_v27  ;;  %1728 = vmatprep.subr.bf16.mxu0 %v1876_v28 }
  0x1e   :  { %1750 = vmatprep.subr.bf16.mxu1 %v1877_v29 }
  0x20   :  { %1729 = vmatpush3.bf16.msra.mxu0 %v1878_v30 }
  0x21   :  { %1751 = vmatpush3.bf16.msra.mxu1 %v1879_v31  ;;  %1758 = vmatprep.subr.bf16.mxu0 %v1884_v38 }
  0x22   :  { %1780 = vmatprep.subr.bf16.mxu1 %v1885_v39 }
  0x23   :  { %634 = vmatmul.mubr.bf16.vlgmr.msra.gmra.mrb[0].mxu0 %v1576_v34 }
  0x24   :  { %674 = vmatmul.mubr.bf16.vlgmr.msra.gmra.mrb[0].mxu1 %v1578_v36  ;;  %1759 = vmatpush3.bf16.msra.mxu0 %v1886_v40 }
  0x25   :  { %1781 = vmatpush3.bf16.msra.mxu1 %v1887_v41  ;;  %1760 = vmatprep.subr.bf16.mxu0 %v1888_v42 }
  0x26   :  { %1782 = vmatprep.subr.bf16.mxu1 %v1889_v43  ;;  %713 = vmatprep.mubr.bf16.mxu0 %v1581_v8  ;;  %v1007_v8 = vld [vmem:[%s2520_s11 + $0x40] sm:$0xff] }
  0x27   :  { %753 = vmatprep.mubr.bf16.mxu1 %v1583_v11 }
  0x28   :  { %1761 = vmatpush3.bf16.msra.mxu0 %v1890_v44 }
  0x29   :  { %1783 = vmatpush3.bf16.msra.mxu1 %v1891_v45  ;;  %1762 = vmatprep.subr.bf16.mxu0 %v1892_v46  ;;  %v1926_v46 = vld [vmem:[%s2514_s7 + $0x10] sm:$0xff]  }
  0x2a   :  { %1784 = vmatprep.subr.bf16.mxu1 %v1893_v47  ;;  %v1927_v47 = vld [vmem:[%s2514_s7 + $0x18] sm:$0xff]  }
  0x2c   :  { %1763 = vmatpush3.bf16.msra.mxu0 %v1894_v48  ;;  %v1648_v48 = vld [vmem:[%s2516_s6] ss:$0 sm:$0xff] }
  0x2d   :  { %1785 = vmatpush3.bf16.msra.mxu1 %v1895_v49  ;;  %1764 = vmatprep.subr.bf16.mxu0 %v1896_v50 }
  0x2e   :  { %1786 = vmatprep.subr.bf16.mxu1 %v1897_v51 }
  0x30   :  { %1765 = vmatpush3.bf16.msra.mxu0 %v1898_v52 }
  0x31   :  { %1787 = vmatpush3.bf16.msra.mxu1 %v1899_v53  ;;  %1766 = vmatprep.subr.bf16.mxu0 %v1900_v54 }
  0x32   :  { %1788 = vmatprep.subr.bf16.mxu1 %v1901_v55 }
  0x34   :  { %1767 = vmatpush3.bf16.msra.mxu0 %v1902_v56  ;;  %v941_v56 = vld [vmem:[%s2517_s9] sm:$0x1] }
  0x35   :  { %1789 = vmatpush3.bf16.msra.mxu1 %v1903_v57  ;;  %1768 = vmatprep.subr.bf16.mxu0 %v1904_v58  ;;  %v955_v57 = vsel %vm953_vm2, %v941_v56, 0  ;;  %v1654_v58 = vld [vmem:[%s2518_s8] ss:$0 sm:$0xff]  ;;  %v1010_v56 = vld [vmem:[%s2520_s11 + $0x58] sm:$0xff] }
  0x36   :  { %1790 = vmatprep.subr.bf16.mxu1 %v1905_v59 }
  0x38   :  { %1769 = vmatpush3.bf16.msra.mxu0 %v1906_v60 }
  0x39   :  { %1791 = vmatpush3.bf16.msra.mxu1 %v1907_v61  ;;  %1770 = vmatprep.subr.bf16.mxu0 %v1908_v62 }
  0x3a   :  { %1792 = vmatprep.subr.bf16.mxu1 %v1909_v63 }
  0x3c   :  { %1771 = vmatpush3.bf16.msra.mxu0 %v1910_v0 }
  0x3d   :  { %1793 = vmatpush3.bf16.msra.mxu1 %v1911_v1  ;;  %1772 = vmatprep.subr.bf16.mxu0 %v1912_v2  ;;  %v999_v2 = vld [vmem:[%s2520_s11] sm:$0xff] }
  0x3e   :  { %1794 = vmatprep.subr.bf16.mxu1 %v1913_v3  ;;  %v1003_v3 = vld [vmem:[%s2520_s11 + $0x20] sm:$0xff] }
  0x3f   :  { %v1663_v6 = vcombine.high %v999_v2, %v1003_v3 }
  0x40   :  { %1773 = vmatpush3.bf16.msra.mxu0 %v1914_v4  ;;  %v1000_v4 = vld [vmem:[%s2520_s11 + $0x8] sm:$0xff] }
  0x41   :  { %1795 = vmatpush3.bf16.msra.mxu1 %v1915_v5  ;;  %1814 = vmatprep.subr.bf16.mxu0 %v1994_v12  ;;  %v1662_v5 = vcombine.low %v999_v2, %v1003_v3  ;;  %v1022_v2 = vld [vmem:[%s2520_s11 + $0xb8] sm:$0xff] }
  0x42   :  { %1826 = vmatprep.subr.bf16.mxu1 %v1994_v12 }
  0x43   :  { %714 = vmatmul.mubr.bf16.vlgmr.msra.gmra.mrb[4].mxu0 %v1580_v7  ;;  %v1004_v7 = vld [vmem:[%s2520_s11 + $0x28] sm:$0xff] }
  0x44   :  { %754 = vmatmul.mubr.bf16.vlgmr.msra.gmra.mrb[4].mxu1 %v1582_v10  ;;  %1815 = vmatpush3.bf16.msra.mxu0 %v1920_v13  ;;  %v1664_v10 = vcombine.low %v1000_v4, %v1004_v7  ;;  %v1665_v11 = vcombine.high %v1000_v4, %v1004_v7  ;;  %v1670_v13 = vcombine.low %v1007_v8, %v1011_v9  ;;  %v1025_v7 = vld [vmem:[%s2520_s11 + $0xd0] sm:$0xff] }
  0x45   :  { %1816 = vmatprep.subr.bf16.mxu0 %v1994_v12  ;;  %1822 = vmatprep.mubr.msk.bf16.mxu0 %vm1995_vm0, %v1994_v12 }
  0x46   :  { %1834 = vmatprep.mubr.msk.bf16.mxu1 %vm1995_vm0, %v1994_v12  ;;  %1827 = vmatpush3.bf16.msra.mxu1 %v1924_v17 }
  0x47   :  { %1828 = vmatprep.subr.bf16.mxu1 %v1994_v12 }
  0x48   :  { %1817 = vmatpush3.bf16.msra.mxu0 %v1921_v14  ;;  %v1015_v14 = vld [vmem:[%s2520_s11 + $0x80] sm:$0xff] }
  0x49   :  { %1818 = vmatprep.subr.bf16.mxu0 %v1994_v12 }
  0x4a   :  { %1829 = vmatpush3.bf16.msra.mxu1 %v1925_v18 }
  0x4b   :  { %1830 = vmatprep.subr.bf16.mxu1 %v1994_v12 }
  0x4c   :  { %1819 = vmatpush3.bf16.msra.mxu0 %v1922_v15  ;;  %v1019_v15 = vld [vmem:[%s2520_s11 + $0xa0] sm:$0xff] }
  0x4d   :  { %1820 = vmatprep.subr.bf16.mxu0 %v1994_v12  ;;  %v1679_v17 = vcombine.high %v1015_v14, %v1019_v15  ;;  %v1678_v18 = vcombine.low %v1015_v14, %v1019_v15 }
  0x4e   :  { %1831 = vmatpush3.bf16.msra.mxu1 %v1926_v46 }
  0x4f   :  { %1832 = vmatprep.subr.bf16.mxu1 %v1994_v12 }
  0x50   :  { %1821 = vmatpush3.bf16.msra.mxu0 %v1923_v16 }
  0x51   :  { %1838 = vmatprep.subr.bf16.mxu0 %v1994_v12 }
  0x52   :  { %1833 = vmatpush3.bf16.msra.mxu1 %v1927_v47 }
  0x53   :  { %1236 = vmatprep.subr.bf16.mxu1 %v1663_v6 }
  0xf6   :  { %v1730_v19 = vpop.f32.mrb[0].mxu0 }
  0xf7   :  { %v1752_v20 = vpop.f32.mrb[0].mxu1  ;;  %v1731_v22 = vpop.f32.mrb[1].mxu0 }
  0xf8   :  { %v1753_v23 = vpop.f32.mrb[1].mxu1  ;;  %v1732_v24 = vadd.f32 %v1731_v22, %v1730_v19  ;;  %v1733_v26 = vpop.f32.mrb[2].mxu0  ;;  %v933_v19 = vld [vmem:[%s2521_s1] sm:$0xff]  ;;  %v1008_v22 = vld [vmem:[%s2520_s11 + $0x48] sm:$0xff] }
  0xf9   :  { %v1754_v25 = vadd.f32 %v1753_v23, %v1752_v20  ;;  %v1755_v27 = vpop.f32.mrb[2].mxu1  ;;  %v1734_v28 = vpop.f32.mrb[3].mxu0  ;;  %v1012_v23 = vld [vmem:[%s2520_s11 + $0x68] sm:$0xff] }
  0xfa   :  { %v1756_v29 = vpop.f32.mrb[3].mxu1  ;;  %v636_v30 = vadd.f32 %v1732_v24, %v1575_v21  ;;  %v1673_v26 = vcombine.high %v1008_v22, %v1012_v23  ;;  %v1016_v27 = vld [vmem:[%s2520_s11 + $0x88] sm:$0xff] }
  0xfb   :  { %v1020_v28 = vld [vmem:[%s2520_s11 + $0xa8] sm:$0xff]  ;;  %v1672_v29 = vcombine.low %v1008_v22, %v1012_v23 }
  0xfc   :  { %v676_v31 = vadd.f32 %v1754_v25, %v636_v30  ;;  %v1681_v30 = vcombine.high %v1016_v27, %v1020_v28 }
 0x116   :  { %v1774_v32 = vpop.f32.mrb[4].mxu0 }
 0x117   :  { %v1796_v33 = vpop.f32.mrb[4].mxu1  ;;  %v1775_v34 = vpop.f32.mrb[5].mxu0 }
 0x118   :  { %v1797_v35 = vpop.f32.mrb[5].mxu1  ;;  %v1776_v36 = vadd.f32 %v1775_v34, %v1774_v32  ;;  %v1777_v38 = vpop.f32.mrb[6].mxu0  ;;  %v1023_v32 = vld [vmem:[%s2520_s11 + $0xc0] sm:$0xff]  ;;  %v1024_v34 = vld [vmem:[%s2520_s11 + $0xc8] sm:$0xff] }
 0x119   :  { %v1798_v37 = vadd.f32 %v1797_v35, %v1796_v33  ;;  %v1799_v39 = vpop.f32.mrb[6].mxu1  ;;  %v1778_v40 = vpop.f32.mrb[7].mxu0  ;;  %v1027_v33 = vld [vmem:[%s2520_s11 + $0xe0] sm:$0xff] }
 0x11a   :  { %v1800_v41 = vpop.f32.mrb[7].mxu1  ;;  %v716_v42 = vadd.f32 %v1776_v36, %v676_v31  ;;  %v1680_v31 = vcombine.low %v1016_v27, %v1020_v28  ;;  %v1687_v35 = vcombine.high %v1023_v32, %v1027_v33  ;;  %v1028_v36 = vld [vmem:[%s2520_s11 + $0xe8] sm:$0xff]  ;;  %v1001_v40 = vld [vmem:[%s2520_s11 + $0x10] sm:$0xff] }
 0x11b   :  { %v1688_v38 = vcombine.low %v1024_v34, %v1028_v36  ;;  %v1689_v39 = vcombine.high %v1024_v34, %v1028_v36  ;;  %v1005_v41 = vld [vmem:[%s2520_s11 + $0x30] sm:$0xff] }
 0x11c   :  { %v756_v43 = vadd.f32 %v1798_v37, %v716_v42  ;;  %v1686_v37 = vcombine.low %v1023_v32, %v1027_v33  ;;  %v1002_v42 = vld [vmem:[%s2520_s11 + $0x18] sm:$0xff] }
 0x11e   :  { %v761_v44 = vmax.f32 %v756_v43, 0.0  ;;  %v1667_v43 = vcombine.high %v1001_v40, %v1005_v41 }
 0x120   :  { %v762_v45 = vpack.c.bf16 %v761_v44, %v761_v44  ;;  %v1006_v44 = vld [vmem:[%s2520_s11 + $0x38] sm:$0xff] }
 0x121   :  { %v1668_v46 = vcombine.low %v1002_v42, %v1006_v44  ;;  %v1669_v47 = vcombine.high %v1002_v42, %v1006_v44 }
 0x122   :  { %1823 = vmatmul.mubr.msk.bf16.vlgmr.msra.gmra.mrb[8].mxu0 %vm802_vm1, %v762_v45  ;;  %v1666_v45 = vcombine.low %v1001_v40, %v1005_v41 }
 0x123   :  { %1840 = vmatprep.mubr.msk.bf16.mxu0 %vm1995_vm0, %v1994_v12  ;;  %1839 = vmatpush3.bf16.msra.mxu0 %v955_v57  ;;  %v1671_v12 = vcombine.high %v1007_v8, %v1011_v9  ;;  %v1014_v57 = vld [vmem:[%s2520_s11 + $0x78] sm:$0xff]  ;;  %v1029_v8 = vld [vmem:[%s2520_s11 + $0xf0] sm:$0xff] }
 0x124   :  { %1277 = vmatprep.subr.bf16.mxu0 %v1665_v11  ;;  %v1676_v4 = vcombine.low %v1010_v56, %v1014_v57  ;;  %v1026_v9 = vld [vmem:[%s2520_s11 + $0xd8] sm:$0xff]  ;;  %v1690_v15 = vcombine.low %v1025_v7, %v1029_v8 }
 0x1f5   :  { %v840_v49 = vpop.f32.mrb[8].mxu0 }
 0x1f6   :  { %v841_v50 = vadd.f32 %v1648_v48, %v840_v49  ;;  %v1824_v51 = vpop.f32.mrb[9].mxu0  ;;  %v1997_v48 = vmov 0   ;;  %v1660_v49 = vld [vmem:[%s2522_s10] ss:$0 sm:$0xff] }
 0x1f7   :  { %v843_v52 = vpop.f32.mrb[10].mxu0 }
 0x1f8   :  { %v846_v53 = vmax.f32 %v841_v50, 0.0  ;;  %v1825_v54 = vpop.f32.mrb[11].mxu0 }
 0x1fa   :  { %v847_v55 = vpack.c.bf16 %v846_v53, %v846_v53  ;;  %v1009_v53 = vld [vmem:[%s2520_s11 + $0x50] sm:$0xff] }
 0x1fc   :  { %1835 = vmatmul.mubr.msk.bf16.vlgmr.msra.gmra.mrb[8].mxu1 %vm802_vm1, %v847_v55  ;;  %v1013_v55 = vld [vmem:[%s2520_s11 + $0x70] sm:$0xff] }
 0x1fd   :  { %1237 = vmatpush1.bf16.msra.mxu1 %v1662_v5  ;;  %1268 = vmatprep.mubr.bf16.mxu1 %v1997_v48  ;;  %v1674_v3 = vcombine.low %v1009_v53, %v1013_v55 }
 0x1fe   :  { %1238 = vmatprep.subr.bf16.mxu1 %v1671_v12 }
 0x201   :  { %1239 = vmatpush1.bf16.msra.mxu1 %v1670_v13  ;;  %v1691_v13 = vcombine.high %v1025_v7, %v1029_v8 }
 0x202   :  { %1240 = vmatprep.subr.bf16.mxu1 %v1679_v17  ;;  %v1033_v17 = vlaneseq }
 0x205   :  { %1241 = vmatpush1.bf16.msra.mxu1 %v1678_v18  ;;  %v1034_v18 = vshrl.u32 %v1033_v17, 7 }
 0x206   :  { %1242 = vmatprep.subr.bf16.mxu1 %v1687_v35 }
 0x207   :  { %v1039_v22 = vsub.s32 1, %v1034_v18  ;;  %v1047_v23 = vsub.s32 3, %v1034_v18  ;;  %v1051_v44 = vsub.s32 4, %v1034_v18 }
 0x209   :  { %1243 = vmatpush1.bf16.msra.mxu1 %v1686_v37 }
 0x20a   :  { %1318 = vmatprep.subr.bf16.mxu1 %v1667_v43 }
 0x2cf   :  { %v924_v59 = vpop.f32.mrb[8].mxu1 }
 0x2d0   :  { %v925_v60 = vadd.f32 %v1654_v58, %v924_v59  ;;  %v1836_v61 = vpop.f32.mrb[9].mxu1 }
 0x2d1   :  { %v927_v62 = vpop.f32.mrb[10].mxu1  ;;  %v1675_v61 = vcombine.high %v1009_v53, %v1013_v55 }
 0x2d2   :  { %v930_v63 = vmul.f32 0.5, %v925_v60  ;;  %v1837_v0 = vpop.f32.mrb[11].mxu1  ;;  %1561 = vst.msk [vmem:[%s2519_s15 + $0x8] sm:$0xff] %vm949_vm3, %v925_v60  ;;  %v1677_v62 = vcombine.high %v1010_v56, %v1014_v57 }
 0x2d3   :  { %v1021_v0 = vld [vmem:[%s2520_s11 + $0xb0] sm:$0xff] }
 0x2d4   :  { %v931_v1 = vmul.f32 1.442695, %v930_v63  ;;  %v1017_v63 = vld [vmem:[%s2520_s11 + $0x90] sm:$0xff] }
 0x2d5   :  { %v1683_v5 = vcombine.high %v1017_v63, %v1021_v0  ;;  %v1682_v11 = vcombine.low %v1017_v63, %v1021_v0 }
 0x2d6   :  { %1928 = vpow2.f32 %v931_v1  ;;  %v1018_v1 = vld [vmem:[%s2520_s11 + $0x98] sm:$0xff] }
 0x2d7   :  { %v1685_v6 = vcombine.high %v1018_v1, %v1022_v2  ;;  %v1684_v12 = vcombine.low %v1018_v1, %v1022_v2 }
 0x2e0   :  { %v1929_v16 = vpop.eup %1928 }
 0x2e1   :  { %935 = vrot.lane.b32.xlu0 %v1929_v16, %s1996_s3 }
 0x353   :  { %v936_v20 = vpop.permute.xlu0 %935 }
 0x354   :  { %v938_v21 = vmul.f32 %v936_v20, %v933_v19  ;;  %1562 = vst.msk [vmem:[%s2519_s15 + $0x10] sm:$0xff] %vm949_vm3, %v936_v20  ;;  %v1035_v19 = vsub.s32 0, %v1034_v18  ;;  %v1043_v20 = vsub.s32 2, %v1034_v18 }
 0x356   :  { %v939_v24 = vadd.f32 %v938_v21, %v925_v60  ;;  %v1031_v21 = vld [vmem:[%s2523_s12] sm:$0xff] }
 0x357   :  { %v1048_v27 = vrot.slane %v1031_v21, %v1047_v23 }
 0x358   :  { %v940_v25 = vpack.c.bf16 %v939_v24, %v939_v24  ;;  %1560 = vst.msk [vmem:[%s2519_s15] sm:$0xff] %vm949_vm3, %v939_v24  ;;  %v1036_v24 = vrot.slane %v1031_v21, %v1035_v19 }
 0x35a   :  { %1841 = vmatmul.mubr.msk.bf16.vlgmr.msra.gmra.mrb[12].mxu0 %vm949_vm3, %v940_v25  ;;  %v1044_v25 = vrot.slane %v1031_v21, %v1043_v20 }
 0x35b   :  { %1278 = vmatpush1.bf16.msra.mxu0 %v1664_v10  ;;  %1309 = vmatprep.mubr.bf16.mxu0 %v1997_v48  ;;  %v1030_v10 = vld [vmem:[%s2520_s11 + $0xf8] sm:$0xff] }
 0x35c   :  { %1279 = vmatprep.subr.bf16.mxu0 %v1673_v26  ;;  %v1693_v14 = vcombine.high %v1026_v9, %v1030_v10  ;;  %v1692_v16 = vcombine.low %v1026_v9, %v1030_v10  ;;  %v1040_v26 = vrot.slane %v1031_v21, %v1039_v22 }
 0x35f   :  { %1280 = vmatpush1.bf16.msra.mxu0 %v1672_v29 }
 0x360   :  { %1281 = vmatprep.subr.bf16.mxu0 %v1681_v30 }
 0x363   :  { %1282 = vmatpush1.bf16.msra.mxu0 %v1680_v31 }
 0x364   :  { %1283 = vmatprep.subr.bf16.mxu0 %v1689_v39 }
 0x367   :  { %1284 = vmatpush1.bf16.msra.mxu0 %v1688_v38 }
 0x368   :  { %1359 = vmatprep.subr.bf16.mxu0 %v1669_v47  ;;  %v1063_v47 = vsub.s32 7, %v1034_v18 }
 0x42d   :  { %v991_v50 = vpop.f32.mrb[12].mxu0 }
 0x42e   :  { %v992_v51 = vadd.f32 %v1660_v49, %v991_v50  ;;  %v1842_v52 = vpop.f32.mrb[13].mxu0  ;;  %v1052_v49 = vrot.slane %v1031_v21, %v1051_v44 }
 0x42f   :  { %v994_v54 = vpop.f32.mrb[14].mxu0  ;;  %v1064_v52 = vrot.slane %v1031_v21, %v1063_v47 }
 0x430   :  { %v997_v58 = vmax.f32 %v992_v51, 0.0  ;;  %v1843_v59 = vpop.f32.mrb[15].mxu0 }
 0x432   :  { %v998_v60 = vpack.c.bf16 %v997_v58, %v997_v58 }
 0x434   :  { %1694 = vmatmul.mubr.msk.bf16.vlgmr.msra.gmra.mrb[12].mxu1 %vm802_vm1, %v998_v60  ;;  %1695 = vmatmul.mubr.msk.bf16.vlgmr.msra.gmra.mrb[16].mxu0 %vm802_vm1, %v998_v60 }
 0x435   :  { %1319 = vmatpush1.bf16.msra.mxu1 %v1666_v45  ;;  %1360 = vmatpush1.bf16.msra.mxu0 %v1668_v46  ;;  %v1059_v45 = vsub.s32 6, %v1034_v18  ;;  %v1055_v46 = vsub.s32 5, %v1034_v18 }
 0x436   :  { %1320 = vmatprep.subr.bf16.mxu1 %v1675_v61  ;;  %1361 = vmatprep.subr.bf16.mxu0 %v1677_v62 }
 0x437   :  { %1350 = vmatprep.mubr.bf16.mxu1 %v1997_v48  ;;  %1391 = vmatprep.mubr.bf16.mxu0 %v1997_v48  ;;  %v1060_v50 = vrot.slane %v1031_v21, %v1059_v45  ;;  %v1056_v51 = vrot.slane %v1031_v21, %v1055_v46  ;;  %v1496_v45 = vld [vmem:[%s2525_s2] sm:$0xff]  ;;  %v1498_v46 = vld [vmem:[%s2525_s2 + $0x10] sm:$0xff] }
 0x439   :  { %1321 = vmatpush1.bf16.msra.mxu1 %v1674_v3  ;;  %1362 = vmatpush1.bf16.msra.mxu0 %v1676_v4 }
 0x43a   :  { %1322 = vmatprep.subr.bf16.mxu1 %v1683_v5  ;;  %1363 = vmatprep.subr.bf16.mxu0 %v1685_v6 }
 0x43d   :  { %1323 = vmatpush1.bf16.msra.mxu1 %v1682_v11  ;;  %1364 = vmatpush1.bf16.msra.mxu0 %v1684_v12 }
 0x43e   :  { %1324 = vmatprep.subr.bf16.mxu1 %v1691_v13  ;;  %1365 = vmatprep.subr.bf16.mxu0 %v1693_v14 }
 0x441   :  { %1325 = vmatpush1.bf16.msra.mxu1 %v1690_v15  ;;  %1366 = vmatpush1.bf16.msra.mxu0 %v1692_v16 }
 0x444   :  { %1696 = vmatmul.mubr.msk.bf16.vlgmr.msra.gmra.mrb[16].mxu1 %vm802_vm1, %v998_v60  ;;  %1697 = vmatmul.mubr.msk.bf16.vlgmr.msra.gmra.mrb[20].mxu0 %vm802_vm1, %v998_v60 }
 0x507   :  { %v1270_v28 = vpop.f32.mrb[12].mxu1  ;;  %v1311_v29 = vpop.f32.mrb[16].mxu0 }
 0x508   :  { %v1271_v30 = vadd.f32 %v1270_v28, %v1036_v24  ;;  %v1312_v31 = vadd.f32 %v1311_v29, %v1044_v25  ;;  %v1272_v32 = vpop.f32.mrb[13].mxu1  ;;  %v1313_v33 = vpop.f32.mrb[17].mxu0 }
 0x509   :  { %v1273_v34 = vadd.f32 %v1272_v32, %v1040_v26  ;;  %v1314_v35 = vadd.f32 %v1313_v33, %v1048_v27  ;;  %v1274_v36 = vpop.f32.mrb[14].mxu1  ;;  %v1315_v37 = vpop.f32.mrb[18].mxu0 }
 0x50a   :  { %v1698_v38 = vmul.f32 -1.442695, %v1271_v30  ;;  %v1700_v39 = vmul.f32 -1.442695, %v1312_v31  ;;  %v1275_v40 = vpop.f32.mrb[15].mxu1  ;;  %v1316_v41 = vpop.f32.mrb[19].mxu0 }
 0x50b   :  { %v1699_v42 = vmul.f32 -1.442695, %v1273_v34  ;;  %v1701_v43 = vmul.f32 -1.442695, %v1314_v35 }
 0x50c   :  { %1930 = vpow2.f32 %v1698_v38 }
 0x50d   :  { %1932 = vpow2.f32 %v1700_v39 }
 0x50e   :  { %1934 = vpow2.f32 %v1699_v42 }
 0x50f   :  { %1936 = vpow2.f32 %v1701_v43 }
 0x516   :  { %v1931_v53 = vpop.eup %1930 }
 0x517   :  { %v1933_v54 = vpop.eup %1932  ;;  %v1424_v55 = vadd.f32 1.0, %v1931_v53  ;;  %v1352_v56 = vpop.f32.mrb[16].mxu1 }
 0x518   :  { %v1393_v57 = vpop.f32.mrb[20].mxu0  ;;  %v1935_v58 = vpop.eup %1934  ;;  %v1426_v59 = vadd.f32 1.0, %v1933_v54  ;;  %v1353_v60 = vadd.f32 %v1352_v56, %v1052_v49  ;;  %v1497_v49 = vld [vmem:[%s2525_s2 + $0x8] sm:$0xff] }
 0x519   :  { %v1394_v61 = vadd.f32 %v1393_v57, %v1060_v50  ;;  %v1354_v62 = vpop.f32.mrb[17].mxu1  ;;  %v1395_v63 = vpop.f32.mrb[21].mxu0  ;;  %1938 = vrcp.f32 %v1424_v55  ;;  %v1425_v1 = vadd.f32 1.0, %v1935_v58 }
 0x51a   :  { %v1937_v0 = vpop.eup %1936  ;;  %v1355_v2 = vadd.f32 %v1354_v62, %v1056_v51  ;;  %v1396_v3 = vadd.f32 %v1395_v63, %v1064_v52  ;;  %v1356_v4 = vpop.f32.mrb[18].mxu1  ;;  %1940 = vrcp.f32 %v1426_v59  ;;  %v1702_v7 = vmul.f32 -1.442695, %v1353_v60  ;;  %v1499_v52 = vld [vmem:[%s2525_s2 + $0x18] sm:$0xff] }
 0x51b   :  { %v1397_v5 = vpop.f32.mrb[22].mxu0  ;;  %v1427_v6 = vadd.f32 1.0, %v1937_v0  ;;  %v1704_v8 = vmul.f32 -1.442695, %v1394_v61  ;;  %v1357_v9 = vpop.f32.mrb[19].mxu1  ;;  %1942 = vrcp.f32 %v1425_v1 }
 0x51c   :  { %v1703_v10 = vmul.f32 -1.442695, %v1355_v2  ;;  %v1398_v11 = vpop.f32.mrb[23].mxu0  ;;  %v1705_v12 = vmul.f32 -1.442695, %v1396_v3  ;;  %v1500_v9 = vld [vmem:[%s2525_s2 + $0x20] sm:$0xff] }
 0x51d   :  { %1944 = vrcp.f32 %v1427_v6 }
 0x51e   :  { %1946 = vpow2.f32 %v1702_v7 }
 0x51f   :  { %1948 = vpow2.f32 %v1704_v8 }
 0x520   :  { %1950 = vpow2.f32 %v1703_v10  ;;  %v1502_v10 = vld [vmem:[%s2525_s2 + $0x30] sm:$0xff] }
 0x521   :  { %1952 = vpow2.f32 %v1705_v12  ;;  %v1501_v12 = vld [vmem:[%s2525_s2 + $0x28] sm:$0xff] }
 0x523   :  { %v1939_v13 = vpop.eup %1938 }
 0x524   :  { %v1941_v14 = vpop.eup %1940  ;;  %v1706_v15 = vmul.f32 -1.442695, %v1939_v13  ;;  %1536 = vst [vmem:[%s2524_s13] sm:$0xff] %v1939_v13 }
 0x525   :  { %v1943_v16 = vpop.eup %1942  ;;  %v1708_v17 = vmul.f32 -1.442695, %v1941_v14  ;;  %1538 = vst [vmem:[%s2524_s13 + $0x10] sm:$0xff] %v1941_v14 }
 0x526   :  { %1954 = vpow2.f32 %v1706_v15  ;;  %v1707_v19 = vmul.f32 -1.442695, %v1943_v16  ;;  %1537 = vst [vmem:[%s2524_s13 + $0x8] sm:$0xff] %v1943_v16  ;;  %v1503_v15 = vld [vmem:[%s2525_s2 + $0x38] sm:$0xff] }
 0x527   :  { %v1945_v18 = vpop.eup %1944  ;;  %1956 = vpow2.f32 %v1708_v17 }
 0x528   :  { %v1947_v20 = vpop.eup %1946  ;;  %v1709_v21 = vmul.f32 -1.442695, %v1945_v18  ;;  %1539 = vst [vmem:[%s2524_s13 + $0x18] sm:$0xff] %v1945_v18  ;;  %1958 = vpow2.f32 %v1707_v19 }
 0x529   :  { %v1949_v22 = vpop.eup %1948  ;;  %v1428_v23 = vadd.f32 1.0, %v1947_v20 }
 0x52a   :  { %v1951_v24 = vpop.eup %1950  ;;  %1960 = vpow2.f32 %v1709_v21  ;;  %v1430_v25 = vadd.f32 1.0, %v1949_v22 }
 0x52b   :  { %v1953_v26 = vpop.eup %1952  ;;  %1962 = vrcp.f32 %v1428_v23  ;;  %v1429_v27 = vadd.f32 1.0, %v1951_v24 }
 0x52c   :  { %1964 = vrcp.f32 %v1430_v25  ;;  %v1431_v28 = vadd.f32 1.0, %v1953_v26 }
 0x52d   :  { %1966 = vrcp.f32 %v1429_v27 }
 0x52e   :  { %1968 = vrcp.f32 %v1431_v28 }
 0x530   :  { %v1955_v29 = vpop.eup %1954 }
 0x531   :  { %v1957_v30 = vpop.eup %1956  ;;  %v1472_v31 = vadd.f32 1.0, %v1955_v29 }
 0x532   :  { %v1959_v32 = vpop.eup %1958  ;;  %v1474_v33 = vadd.f32 1.0, %v1957_v30 }
 0x533   :  { %1970 = vrcp.f32 %v1472_v31  ;;  %v1473_v35 = vadd.f32 1.0, %v1959_v32 }
 0x534   :  { %v1961_v34 = vpop.eup %1960  ;;  %1972 = vrcp.f32 %v1474_v33 }
 0x535   :  { %v1963_v36 = vpop.eup %1962  ;;  %v1475_v37 = vadd.f32 1.0, %v1961_v34  ;;  %1974 = vrcp.f32 %v1473_v35 }
 0x536   :  { %v1965_v38 = vpop.eup %1964  ;;  %v1710_v39 = vmul.f32 -1.442695, %v1963_v36  ;;  %1540 = vst [vmem:[%s2524_s13 + $0x20] sm:$0xff] %v1963_v36 }
 0x537   :  { %v1967_v40 = vpop.eup %1966  ;;  %1976 = vrcp.f32 %v1475_v37  ;;  %v1712_v41 = vmul.f32 -1.442695, %v1965_v38  ;;  %1542 = vst [vmem:[%s2524_s13 + $0x30] sm:$0xff] %v1965_v38 }
 0x538   :  { %v1969_v42 = vpop.eup %1968  ;;  %1978 = vpow2.f32 %v1710_v39  ;;  %v1711_v43 = vmul.f32 -1.442695, %v1967_v40  ;;  %1541 = vst [vmem:[%s2524_s13 + $0x28] sm:$0xff] %v1967_v40 }
 0x539   :  { %1980 = vpow2.f32 %v1712_v41  ;;  %v1713_v44 = vmul.f32 -1.442695, %v1969_v42  ;;  %1543 = vst [vmem:[%s2524_s13 + $0x38] sm:$0xff] %v1969_v42 }
 0x53a   :  { %1982 = vpow2.f32 %v1711_v43 }
 0x53b   :  { %1984 = vpow2.f32 %v1713_v44 }
 0x53d   :  { %v1971_v47 = vpop.eup %1970 }
 0x53e   :  { %v1973_v50 = vpop.eup %1972  ;;  %vm1504_vm4 = vcmp.lt.f32.partialorder %v1496_v45, %v1971_v47 }
 0x53f   :  { %v1975_v51 = vpop.eup %1974  ;;  %vm1512_vm5 = vmpackc.low %vm1504_vm4, %vm1504_vm4  ;;  %vm1506_vm6 = vcmp.lt.f32.partialorder %v1498_v46, %v1973_v50 }
 0x540   :  { %vm1513_vm7 = vmpackc.even %vm1512_vm5, %vm1512_vm5  ;;  %vm1505_vm8 = vcmp.lt.f32.partialorder %v1497_v49, %v1975_v51 }
 0x541   :  { %v1977_v53 = vpop.eup %1976  ;;  %v1528_v55 = vsel %vm1513_vm7, 16843009, %v1997_v48  ;;  %vm1516_vm9 = vmpackc.low %vm1506_vm6, %vm1506_vm6 }
 0x542   :  { %v1979_v54 = vpop.eup %1978  ;;  %vm1517_vm10 = vmpackc.even %vm1516_vm9, %vm1516_vm9  ;;  %vm1507_vm11 = vcmp.lt.f32.partialorder %v1499_v52, %v1977_v53  ;;  %v1544_v62 = vunpack.c.0.s8 %v1528_v55 }
 0x543   :  { %v1981_v56 = vpop.eup %1980  ;;  %v1476_v57 = vadd.f32 1.0, %v1979_v54  ;;  %v1530_v59 = vsel %vm1517_vm10, 16843009, %v1997_v48  ;;  %vm1514_vm12 = vmpackc.low %vm1505_vm8, %vm1505_vm8 }
 0x544   :  { %v1983_v58 = vpop.eup %1982  ;;  %v1478_v60 = vadd.f32 1.0, %v1981_v56  ;;  %vm1515_vm13 = vmpackc.even %vm1514_vm12, %vm1514_vm12  ;;  %v1546_v2 = vunpack.c.0.s8 %v1530_v59 }
 0x545   :  { %v1985_v61 = vpop.eup %1984  ;;  %1986 = vrcp.f32 %v1476_v57  ;;  %v1477_v63 = vadd.f32 1.0, %v1983_v58  ;;  %v1529_v0 = vsel %vm1515_vm13, 16843009, %v1997_v48  ;;  %vm1518_vm14 = vmpackc.low %vm1507_vm11, %vm1507_vm11 }
 0x546   :  { %1988 = vrcp.f32 %v1478_v60  ;;  %v1479_v1 = vadd.f32 1.0, %v1985_v61  ;;  %v1545_v3 = vunpack.c.0.s8 %v1529_v0  ;;  %vm1519_vm15 = vmpackc.even %vm1518_vm14, %vm1518_vm14 }
 0x547   :  { %1990 = vrcp.f32 %v1477_v63  ;;  %v1531_v4 = vsel %vm1519_vm15, 16843009, %v1997_v48 }
 0x548   :  { %1992 = vrcp.f32 %v1479_v1  ;;  %v1552_v5 = vpack.c.b16 %v1545_v3, %v1544_v62  ;;  %v1547_v6 = vunpack.c.0.s8 %v1531_v4 }
 0x54a   :  { %v1553_v7 = vpack.c.b16 %v1547_v6, %v1546_v2 }
 0x54c   :  { %v1554_v8 = vpack.c.b8 %v1553_v7, %v1552_v5 }
 0x54e   :  { %1558 = vst [vmem:[%s2526_s14] sm:$0xff] %v1554_v8 }
 0x54f   :  { %v1987_v11 = vpop.eup %1986 }
 0x550   :  { %v1989_v13 = vpop.eup %1988  ;;  %vm1508_vm0 = vcmp.lt.f32.partialorder %v1500_v9, %v1987_v11 }
 0x551   :  { %v1991_v14 = vpop.eup %1990  ;;  %vm1520_vm1 = vmpackc.low %vm1508_vm0, %vm1508_vm0  ;;  %vm1510_vm2 = vcmp.lt.f32.partialorder %v1502_v10, %v1989_v13 }
 0x552   :  { %v1993_v16 = vpop.eup %1992  ;;  %vm1521_vm3 = vmpackc.even %vm1520_vm1, %vm1520_vm1  ;;  %vm1509_vm4 = vcmp.lt.f32.partialorder %v1501_v12, %v1991_v14 }
 0x553   :  { %v1532_v17 = vsel %vm1521_vm3, 16843009, %v1997_v48  ;;  %vm1524_vm5 = vmpackc.low %vm1510_vm2, %vm1510_vm2  ;;  %vm1511_vm7 = vcmp.lt.f32.partialorder %v1503_v15, %v1993_v16 }
 0x554   :  { %vm1525_vm6 = vmpackc.even %vm1524_vm5, %vm1524_vm5  ;;  %v1548_v19 = vunpack.c.0.s8 %v1532_v17 }
 0x555   :  { %v1534_v18 = vsel %vm1525_vm6, 16843009, %v1997_v48  ;;  %vm1522_vm8 = vmpackc.low %vm1509_vm4, %vm1509_vm4 }
 0x556   :  { %vm1523_vm9 = vmpackc.even %vm1522_vm8, %vm1522_vm8  ;;  %v1550_v21 = vunpack.c.0.s8 %v1534_v18 }
 0x557   :  { %v1533_v20 = vsel %vm1523_vm9, 16843009, %v1997_v48  ;;  %vm1526_vm10 = vmpackc.low %vm1511_vm7, %vm1511_vm7 }
 0x558   :  { %v1549_v22 = vunpack.c.0.s8 %v1533_v20  ;;  %vm1527_vm11 = vmpackc.even %vm1526_vm10, %vm1526_vm10 }
 0x559   :  { %v1535_v23 = vsel %vm1527_vm11, 16843009, %v1997_v48 }
 0x55a   :  { %v1555_v24 = vpack.c.b16 %v1549_v22, %v1548_v19  ;;  %v1551_v25 = vunpack.c.0.s8 %v1535_v23 }
 0x55c   :  { %v1556_v26 = vpack.c.b16 %v1551_v25, %v1550_v21 }
 0x55e   :  { %v1557_v27 = vpack.c.b8 %v1556_v26, %v1555_v24 }
 0x560   :  { %1559 = vst [vmem:[%s2526_s14 + $0x8] sm:$0xff] %v1557_v27 }

</bundles_post_ra>
